<compile_context>
chip_gen: v5e
topology: v5e:2x2
jax: 0.10.0
libtpu: 0.0.40
codegen_flags: <defaults>
</compile_context>

<pallas_src>
import jax
import jax.numpy as jnp
from jax.experimental import pallas as pl
from jax.experimental.pallas import tpu as pltpu

NUM_OPS = 4  # len(self.operations)


# --------------------------------------------------------------------------
# Kernel
# --------------------------------------------------------------------------
def _make_kernel(compute_dtype):
    """coeff_ref: SMEM f32[4] = [a_lo, a_hi, b_lo, b_hi] (pre-fused mixture).
       x_ref, o_ref: VMEM [tile_rows, lane] flattened image pixels."""
    def kernel(coeff_ref, x_ref, o_ref):
        a_lo = coeff_ref[0].astype(compute_dtype)
        a_hi = coeff_ref[1].astype(compute_dtype)
        b_lo = coeff_ref[2].astype(compute_dtype)
        b_hi = coeff_ref[3].astype(compute_dtype)
        x = x_ref[...].astype(compute_dtype)
        lo = x < 0.5
        a = jnp.where(lo, a_lo, a_hi)
        b = jnp.where(lo, b_lo, b_hi)
        o_ref[...] = (a * x + b).astype(o_ref.dtype)
    return kernel


# --------------------------------------------------------------------------
# Wrapper-side mixture fusion
# --------------------------------------------------------------------------
def _mixture_coeffs(mix):
    """Fuse  w0*x + w1*(1-x) + w2*(0.8*x) + w3*solarize(x)  into select+FMA.

       out = where(x<0.5, a_lo*x + b_lo, a_hi*x + b_hi)
       a_lo = w0 - w1 + 0.8*w2 + w3   b_lo = w1
       a_hi = w0 - w1 + 0.8*w2 - w3   b_hi = w1 + w3
    """
    mix = mix.astype(jnp.float32)
    w0, w1, w2, w3 = mix[0], mix[1], mix[2], mix[3]
    slope = w0 - w1 + 0.8 * w2
    return jnp.stack([slope + w3, slope - w3, w1, w1 + w3])


# --------------------------------------------------------------------------
# Generation-aware configuration
# --------------------------------------------------------------------------
def _tpu_generation():
    try:
        kind = jax.devices()[0].device_kind.lower()
    except Exception:
        return "unknown"
    if "v5" in kind:
        return "v5e"
    if "v6" in kind:
        return "v6e"
    if "v7" in kind:
        return "v7x"
    return "unknown"


# gen -> (per-buffer tile target bytes, vmem_limit_bytes, bf16 VALU ok, 2 TCs/chip)
_GEN_CONFIG = {
    "v5e":     (2 << 20, 32 << 20, False, False),
    "v6e":     (6 << 20, 48 << 20, True,  False),
    "v7x":     (4 << 20, 36 << 20, True,  True),
    "unknown": (2 << 20, None,     False, False),
}


def _sublane_multiple(dtype):
    itemsize = jnp.dtype(dtype).itemsize
    return {4: 8, 2: 16, 1: 32}.get(itemsize, 8)


# --------------------------------------------------------------------------
# Layout / tiling helpers
# --------------------------------------------------------------------------
def _layout_2d(total, dtype):
    """Lane-dense 2-D shape (rows, lane): lane multiple of 128, rows multiple of
       the dtype sublane packing.  Returns (rows, lane, pad_elems)."""
    sub = _sublane_multiple(dtype)
    for lane in (2048, 1024, 512, 256, 128):
        if total % (lane * sub) == 0:
            return total // lane, lane, 0
    # Pad to the next multiple of 128*sub (one extra wrapper-side copy, but
    # keeps stores unmasked and the pipeline double-buffered).
    lane = 128
    block = lane * sub
    padded = ((total + block - 1) // block) * block
    return padded // lane, lane, padded - total


def _choose_tile_rows(rows, lane, itemsize, sub, target_bytes, prefer_multi_step):
    """Largest row-tile (multiple of `sub`, dividing rows) with <= target_bytes
       per buffer.  If prefer_multi_step (v7x megacore), cap the tile at rows//2
       so the parallel grid axis has >=2 steps whenever possible."""
    max_rows = max(sub, ((target_bytes // (lane * itemsize)) // sub) * sub)
    cap = rows
    if prefer_multi_step and rows >= 2 * sub:
        cap = rows // 2
    t = (min(max_rows, cap) // sub) * sub
    while t >= sub:
        if rows % t == 0:
            return t
        t -= sub
    return rows  # only reachable for tiny inputs (rows < 2*sub) — always safe


# --------------------------------------------------------------------------
# pallas_call driver
# --------------------------------------------------------------------------
def _run_kernel(coeffs, x_flat):
    gen = _tpu_generation()
    target_bytes, vmem_limit, bf16_ok, two_tc = _GEN_CONFIG[gen]

    rows, lane = x_flat.shape
    dtype = x_flat.dtype
    itemsize = jnp.dtype(dtype).itemsize
    sub = _sublane_multiple(dtype)
    tile_rows = _choose_tile_rows(rows, lane, itemsize, sub, target_bytes, two_tc)
    grid = (rows // tile_rows,)

    # Compute natively in bf16 on chips with bf16 VALUs (v6e/v7x); otherwise
    # (v5e / f32 input) compute in f32 — casts are in-register, HBM unchanged.
    compute_dtype = jnp.bfloat16 if (dtype == jnp.bfloat16 and bf16_ok) else jnp.float32

    return pl.pallas_call(
        _make_kernel(compute_dtype),
        out_shape=jax.ShapeDtypeStruct((rows, lane), dtype),
        grid_spec=pl.GridSpec(
            grid=grid,
            in_specs=[
                pl.BlockSpec(memory_space=pltpu.SMEM),                 # fused coeffs
                pl.BlockSpec((tile_rows, lane), lambda i: (i, 0)),     # pixel tile
            ],
            out_specs=pl.BlockSpec((tile_rows, lane), lambda i: (i, 0)),
        ),
        compiler_params=pltpu.CompilerParams(
            dimension_semantics=("parallel",),  # v7x megacore sharding; no-op on 1-TC chips
            vmem_limit_bytes=vmem_limit,
        ),
        # TODO(synk): if a producer op feeds this in the same jit, consider
        # allow_input_fusion / folding the FMA into the neighbor to skip a full
        # HBM pass — bigger win than any in-kernel tuning on this roofline.
    )(coeffs, x_flat)


# --------------------------------------------------------------------------
# Forward (mirrors SubPolicyStage.forward)
# --------------------------------------------------------------------------
def sub_policy_stage_forward(x_nchw, raw_weights, temperature,
                             soft_select=True, training=True, key=None,
                             io_dtype=None):
    """io_dtype: optional HBM dtype override (e.g. jnp.bfloat16 halves traffic
       on this purely memory-bound op).  Default preserves the input dtype."""
    w = jax.nn.softmax(raw_weights / temperature)  # self.weights property

    if training and soft_select:
        mix = w
    elif training:
        # gumbel_softmax(hard=True): op[idx] * onehot[idx] == op[idx] * 1.0
        g = -jnp.log(-jnp.log(jax.random.uniform(key, raw_weights.shape) + 1e-20) + 1e-20)
        idx = jnp.argmax((raw_weights + g) / temperature)
        mix = jax.nn.one_hot(idx, NUM_OPS, dtype=jnp.float32)
    else:
        # eval: Categorical(self.weights).sample()
        idx = jax.random.categorical(key, jnp.log(w))
        mix = jax.nn.one_hot(idx, NUM_OPS, dtype=jnp.float32)

    coeffs = _mixture_coeffs(mix)

    b, c, h, wid = x_nchw.shape
    if io_dtype is not None:
        x_nchw = x_nchw.astype(io_dtype)
    total = b * c * h * wid

    x1d = x_nchw.reshape(-1)
    rows, lane, pad = _layout_2d(total, x1d.dtype)
    if pad:
        x1d = jnp.pad(x1d, (0, pad))
    out2d = _run_kernel(coeffs, x1d.reshape(rows, lane))
    out1d = out2d.reshape(-1)
    if pad:
        out1d = out1d[:total]
    return out1d.reshape(b, c, h, wid)


# --------------------------------------------------------------------------
# Pure-JAX reference
# --------------------------------------------------------------------------
def _reference(x, mix):
    x = x.astype(jnp.float32)
    ops = jnp.stack([x, 1.0 - x, x * 0.8, jnp.where(x < 0.5, x, 1.0 - x)])
    return (ops * mix.reshape(-1, 1, 1, 1, 1)).sum(0)


if __name__ == "__main__":
    key = jax.random.PRNGKey(0)
    kx, ks, ko = jax.random.split(key, 3)

    # small image-like input, NCHW
    x = jax.random.uniform(kx, (2, 4, 16, 16), dtype=jnp.float32)

    # nn.Parameter(torch.ones(len(operations)))
    raw_weights = jnp.ones((NUM_OPS,), dtype=jnp.float32)
    temperature = 0.1
    mix = jax.nn.softmax(raw_weights / temperature)

    # 1) training + soft_select path (dense, differentiable hot path), f32 I/O
    out = sub_policy_stage_forward(x, raw_weights, temperature,
                                   soft_select=True, training=True)
    out = jax.block_until_ready(out)
    ref = _reference(x, mix)
    assert out.shape == x.shape and out.dtype == x.dtype
    assert jnp.allclose(out, ref, atol=1e-5, rtol=1e-5)

    # 2) hard-select (gumbel) path exercises the same kernel with one-hot weights
    out_hard = sub_policy_stage_forward(x, raw_weights, temperature,
                                        soft_select=False, training=True, key=ks)
    out_hard = jax.block_until_ready(out_hard)
    g = -jnp.log(-jnp.log(jax.random.uniform(ks, raw_weights.shape) + 1e-20) + 1e-20)
    idx = int(jnp.argmax((raw_weights + g) / temperature))
    ref_hard = _reference(x, jax.nn.one_hot(idx, NUM_OPS, dtype=jnp.float32))
    assert jnp.allclose(out_hard, ref_hard, atol=1e-5, rtol=1e-5)

    # 3) bf16 end-to-end I/O (opt-in): halves HBM bytes on this mem-bound op
    out_bf16 = sub_policy_stage_forward(x, raw_weights, temperature,
                                        soft_select=True, training=True,
                                        io_dtype=jnp.bfloat16)
    out_bf16 = jax.block_until_ready(out_bf16)
    assert out_bf16.dtype == jnp.bfloat16 and out_bf16.shape == x.shape
    ref_bf16 = _reference(x.astype(jnp.bfloat16), mix)
    assert jnp.allclose(out_bf16.astype(jnp.float32), ref_bf16, atol=3e-2, rtol=3e-2)

    # 4) awkward (non-lane-aligned) shape exercises the padded layout path
    x_odd = jax.random.uniform(ko, (1, 3, 5, 7), dtype=jnp.float32)
    out_odd = sub_policy_stage_forward(x_odd, raw_weights, temperature,
                                       soft_select=True, training=True)
    out_odd = jax.block_until_ready(out_odd)
    assert jnp.allclose(out_odd, _reference(x_odd, mix), atol=1e-5, rtol=1e-5)

    print("KERNEL_OK")
</pallas_src>

<mosaic_0001>
module attributes {stable_mosaic.version = 11 : i64} {
  func.func @kernel(%arg0: i32, %arg1: memref<4xf32, #tpu.memory_space<smem>>, %arg2: memref<8x256xf32, #tpu.memory_space<vmem>>, %arg3: memref<8x256xf32, #tpu.memory_space<vmem>>) attributes {dimension_semantics = [#tpu.dimension_semantics<parallel>], iteration_bounds = array<i64: 1>, scalar_prefetch = 0 : i64, scratch_operands = 0 : i64, tpu.core_type = #tpu.core_type<tc>, window_params = [{transform_indices = @transform_0, window_bounds = array<i64: 4>}, {transform_indices = @transform_1, window_bounds = array<i64: 8, 256>}, {transform_indices = @transform_2, window_bounds = array<i64: 8, 256>}]} {
    %c0 = arith.constant 0 : index
    %0 = memref.load %arg1[%c0] : memref<4xf32, #tpu.memory_space<smem>>
    %c1 = arith.constant 1 : index
    %1 = memref.load %arg1[%c1] : memref<4xf32, #tpu.memory_space<smem>>
    %c2 = arith.constant 2 : index
    %2 = memref.load %arg1[%c2] : memref<4xf32, #tpu.memory_space<smem>>
    %c3 = arith.constant 3 : index
    %3 = memref.load %arg1[%c3] : memref<4xf32, #tpu.memory_space<smem>>
    %c0_0 = arith.constant 0 : index
    %c0_1 = arith.constant 0 : index
    %4 = vector.load %arg2[%c0_0, %c0_1] : memref<8x256xf32, #tpu.memory_space<vmem>>, vector<8x256xf32>
    %cst = arith.constant 5.000000e-01 : f32
    %5 = vector.broadcast %cst : f32 to vector<8x256xf32>
    %6 = arith.cmpf olt, %4, %5 : vector<8x256xf32>
    %7 = vector.broadcast %0 : f32 to vector<8x256xf32>
    %8 = vector.broadcast %1 : f32 to vector<8x256xf32>
    %9 = arith.select %6, %7, %8 : vector<8x256xi1>, vector<8x256xf32>
    %10 = vector.broadcast %2 : f32 to vector<8x256xf32>
    %11 = vector.broadcast %3 : f32 to vector<8x256xf32>
    %12 = arith.select %6, %10, %11 : vector<8x256xi1>, vector<8x256xf32>
    %13 = arith.mulf %9, %4 : vector<8x256xf32>
    %14 = arith.addf %13, %12 : vector<8x256xf32>
    %c0_2 = arith.constant 0 : index
    %c0_3 = arith.constant 0 : index
    %15 = vector.load %arg3[%c0_2, %c0_3] : memref<8x256xf32, #tpu.memory_space<vmem>>, vector<8x256xf32>
    tpu.vector_store %arg3[%c0_2, %c0_3], %14 {strides = array<i32>} : memref<8x256xf32, #tpu.memory_space<vmem>>, vector<8x256xf32>,
    return
  }
  func.func @transform_0(%arg0: i32) -> i32 {
    %c0_i32 = arith.constant 0 : i32
    %c0_i32_0 = arith.constant 0 : i32
    return %c0_i32 : i32
  }
  func.func @transform_1(%arg0: i32) -> (i32, i32) {
    %c0_i32 = arith.constant 0 : i32
    %c0_i32_0 = arith.constant 0 : i32
    return %arg0, %c0_i32 : i32, i32
  }
  func.func @transform_2(%arg0: i32) -> (i32, i32) {
    %c0_i32 = arith.constant 0 : i32
    %c0_i32_0 = arith.constant 0 : i32
    return %arg0, %c0_i32 : i32, i32
  }
}

</mosaic_0001>

<bundles_post_ra>
// kernel: tpu_custom_call.1
= control target key start
LH: loop header
LB: loop body
LE: loop exit
PB: predicated region body
PF: predicated region fallthrough
CT: control target
= control target key end

     0   :  { %7 = vsyncpa [#allocation5], 0  ;;  %s178_s0 = inlined_call_operand.hbm [shape: f32[4], index: 0, kind: input, shape index: {}]   ;;  %s179_s1 = inlined_call_operand.hbm [shape: f32[8,256], index: 1, kind: input, shape index: {}]   ;;  %s180_s2 = inlined_call_operand.hbm [shape: f32[8,256], index: 2, kind: output, shape index: {}]  }
   0x1   :  { %8 = vsyncpa [#allocation3], 0 }
   0x2   :  { %9 = vsyncpa [#allocation4], 0  ;;  %s15_s11 = sshll.u32 %s178_s0, 4  ;;  %s24_s14 = sshll.u32 %s179_s1, 4  ;;  %s16_s11 = int_to_ptr.hbm [resolvable:$true] %s15_s11  ;;  %s25_s14 = int_to_ptr.hbm [resolvable:$true] %s24_s14 }
   0x3   :  { %s151_s15 = smov [#allocation2]   ;;  %s152_s16 = smov [#allocation6]  }
   0x4   :  { %18 = dma.hbm_to_smem %s16_s11, 16, %s151_s15, [#allocation5]  }
   0x5   :  { %s26_s17 = sshll.u32 %s152_s16, 4  ;;  %s27_s17 = int_to_ptr.vmem [resolvable:$true] %s26_s17 }
   0x6   :  { %29 = dma.hbm_to_vmem [thread:$0]  %s25_s14, 256, %s27_s17, [#allocation3]  }
   0x7   :  { %145 = dma.done.wait [#allocation5], 16  }
   0x8   :  { %146 = vsyncadd [#allocation5], 4294967280 }
   0x9   :  { %147 = dma.done.wait [#allocation3], 256  }
   0xa   :  { %148 = vsyncadd [#allocation3], 4294967040 }
   0xb   :  { %38 = sfence }
   0xc   :  { %s39_s18 = sld [smem:[#allocation2]]  ;;  %v43_v0 = vld [vmem:[#allocation6] sm:$0xff]  ;;  %v44_v1 = vld [vmem:[#allocation6 + $0x8] sm:$0xff]  ;;  %s153_s1 = smov [#allocation7]  }
   0xd   :  { %s79_s19 = sld [smem:[#allocation2 + $0x1]]  ;;  %vm45_vm0 = vcmp.lt.f32.partialorder %v43_v0, 0.5  ;;  %vm46_vm1 = vcmp.lt.f32.partialorder %v44_v1, 0.5  ;;  %s66_s21 = sshll.u32 %s153_s1, 4  ;;  %s67_s21 = int_to_ptr.vmem [resolvable:$true] %s66_s21 }
   0xe   :  { %s80_s0 = sld [smem:[#allocation2 + $0x2]]  ;;  %s68_s24 = sshll.u32 %s180_s2, 4  ;;  %s69_s24 = int_to_ptr.hbm [resolvable:$true] %s68_s24 }
   0xf   :  { %s81_s20 = sld [smem:[#allocation2 + $0x3]] }
  0x12   :  { %v47_v2 = vstv %s39_s18 }
  0x13   :  { %v48_v3 = vstv %s79_s19 }
  0x14   :  { %v49_v4 = vsel %vm45_vm0, %v47_v2, %v48_v3  ;;  %v51_v5 = vstv %s80_s0  ;;  %v50_v6 = vsel %vm46_vm1, %v47_v2, %v48_v3 }
  0x15   :  { %v52_v7 = vstv %s81_s20  ;;  %v55_v8 = vmul.f32 %v49_v4, %v43_v0  ;;  %v56_v9 = vmul.f32 %v50_v6, %v44_v1 }
  0x16   :  { %v53_v10 = vsel %vm45_vm0, %v51_v5, %v52_v7  ;;  %v54_v11 = vsel %vm46_vm1, %v51_v5, %v52_v7 }
  0x17   :  { %v57_v12 = vadd.f32 %v55_v8, %v53_v10  ;;  %v58_v13 = vadd.f32 %v56_v9, %v54_v11 }
  0x19   :  { %59 = vst [vmem:[#allocation7] sm:$0xff] %v57_v12 }
  0x1a   :  { %60 = vst [vmem:[#allocation7 + $0x8] sm:$0xff] %v58_v13 }
  0x1b   :  { %71 = dma.vmem_to_hbm [thread:$0]  %s67_s21, 256, %s69_s24, [#allocation4]  }
  0x1c   :  { %149 = dma.done.wait [#allocation4], 256  }
  0x1d   :  { %150 = vsyncadd [#allocation4], 4294967040 }
  0x1e   :  { %76 = vsyncpa [#allocation3], 1 }
  0x1f   :  { %77 = vsyncpa [#allocation4], 1 }
  0x20   :  { %78 = vsyncpa [#allocation5], 1 }

</bundles_post_ra>
